<compile_context>
chip_gen: v6e
topology: v6e:2x2x1
jax: 0.10.0
libtpu: 0.0.40
codegen_flags: <defaults>
</compile_context>

<pallas_src>
import math
import numpy as np
import jax
import jax.numpy as jnp
from jax.experimental import pallas as pl
from jax.experimental.pallas import tpu as pltpu


def _round_up(x: int, m: int) -> int:
    return ((x + m - 1) // m) * m


# ---------------------------------------------------------------------------
# Kernel A: masked weight normalisation ("get_weights"), fully on-device.
# All operands are (in_features, out_pad) (already transposed + lane-padded),
# so the norm is a sublane reduction and no transpose is required.
# ---------------------------------------------------------------------------
def _get_weights_kernel(wt_ref, dwt_ref, md_ref, mo_ref, w_ref, wpl_ref):
    wt = wt_ref[...]      # (I, O_pad) raw weight (transposed)
    md = md_ref[...]      # (I, O_pad) diagonal-block mask (transposed)
    mo = mo_ref[...]      # (I, O_pad) off-diagonal mask (transposed)
    dwt = dwt_ref[...]    # (1, O_pad) log diagonal scale (transposed)

    w = jnp.exp(wt) * md + wt * mo                       # masked weight
    w_sq_norm = jnp.sum(w * w, axis=0, keepdims=True)    # (1, O_pad)
    # padded (all-zero) output columns would give 0 norm -> clamp keeps them
    # finite; real columns have norm >> 1e-37 so this is a no-op for them.
    w_sq_norm = jnp.maximum(w_sq_norm, 1e-37)

    w_ref[...] = jnp.exp(dwt) * w * jax.lax.rsqrt(w_sq_norm)      # normalised weight (I, O_pad)
    wpl_ref[...] = dwt + wt - 0.5 * jnp.log(w_sq_norm)            # log weights (pre block-gather)


# ---------------------------------------------------------------------------
# Kernel B: batched  y = x @ w + bias  over batch tiles (lane-dense output).
# ---------------------------------------------------------------------------
def _matmul_bias_kernel(x_ref, w_ref, b_ref, o_ref):
    acc = jnp.dot(x_ref[...], w_ref[...], preferred_element_type=jnp.float32)
    o_ref[...] = (acc + b_ref[...]).astype(o_ref.dtype)


class MaskedWeight:
    """JAX/Pallas port of the PyTorch MaskedWeight module (BNAF)."""

    def __init__(self, in_features: int, out_features: int, dim: int,
                 bias: bool = True, *, seed: int = 0, block_rows: int = 256):
        assert in_features % dim == 0 and out_features % dim == 0
        self.in_features, self.out_features, self.dim = in_features, out_features, dim
        self.block_rows = block_rows
        rng = np.random.RandomState(seed)

        o_d = out_features // dim
        i_d = in_features // dim

        # ---- parameter init (mirrors the PyTorch constructor) -------------
        weight = np.zeros((out_features, in_features), dtype=np.float32)
        for i in range(dim):
            fan_in, fan_out = (i + 1) * i_d, o_d
            bound = math.sqrt(6.0 / (fan_in + fan_out))          # xavier_uniform_
            weight[i * o_d:(i + 1) * o_d, 0:(i + 1) * i_d] = rng.uniform(
                -bound, bound, size=(o_d, (i + 1) * i_d)).astype(np.float32)
        diag_weight = np.log(
            rng.uniform(1e-3, 1.0, size=(out_features, 1))).astype(np.float32)
        if bias:
            bnd = 1.0 / math.sqrt(out_features)
            b = rng.uniform(-bnd, bnd, size=(out_features,)).astype(np.float32)
        else:
            b = np.zeros((out_features,), dtype=np.float32)

        mask_d = np.zeros_like(weight)
        mask_o = np.ones_like(weight)
        for i in range(dim):
            mask_d[i * o_d:(i + 1) * o_d, i * i_d:(i + 1) * i_d] = 1.0
            mask_o[i * o_d:(i + 1) * o_d, i * i_d:] = 0.0

        # raw copies (for reference / inspection)
        self._weight_np, self._diag_weight_np = weight, diag_weight
        self._mask_d_np, self._mask_o_np, self._bias_np = mask_d, mask_o, b

        # ---- device params: transposed to (I, O) and lane-padded to O_pad ---
        self.o_pad = _round_up(out_features, 128)
        pad_o = self.o_pad - out_features

        def tp(a):  # (O, I) -> (I, O_pad), zero pad on output axis
            return jnp.asarray(np.pad(a.T, ((0, 0), (0, pad_o))), dtype=jnp.float32)

        self.weight_t = tp(weight)
        self.mask_d_t = tp(mask_d)
        self.mask_o_t = tp(mask_o)
        self.diag_weight_t = jnp.asarray(
            np.pad(diag_weight.T, ((0, 0), (0, pad_o))), dtype=jnp.float32)   # (1, O_pad)
        self.bias_pad = jnp.asarray(
            np.pad(b[None, :], ((0, 0), (0, pad_o))), dtype=jnp.float32)      # (1, O_pad)

    # ---------------- get_weights (Pallas kernel A) ------------------------
    def _get_weights(self):
        I, Opad = self.in_features, self.o_pad
        w_t, wpl_t = pl.pallas_call(
            _get_weights_kernel,
            out_shape=(jax.ShapeDtypeStruct((I, Opad), jnp.float32),
                       jax.ShapeDtypeStruct((I, Opad), jnp.float32)),
            grid_spec=pltpu.PrefetchScalarGridSpec(
                num_scalar_prefetch=0,
                grid=(1,),
                in_specs=[
                    pl.BlockSpec((I, Opad), lambda i: (0, 0)),
                    pl.BlockSpec((1, Opad), lambda i: (0, 0)),
                    pl.BlockSpec((I, Opad), lambda i: (0, 0)),
                    pl.BlockSpec((I, Opad), lambda i: (0, 0)),
                ],
                out_specs=[
                    pl.BlockSpec((I, Opad), lambda i: (0, 0)),
                    pl.BlockSpec((I, Opad), lambda i: (0, 0)),
                ],
            ),
            compiler_params=pltpu.CompilerParams(
                dimension_semantics=("arbitrary",)),
        )(self.weight_t, self.diag_weight_t, self.mask_d_t, self.mask_o_t)
        return w_t, wpl_t

    # ---------------- forward ----------------------------------------------
    def __call__(self, inputs: jax.Array, grad=None):
        B, I = inputs.shape
        assert I == self.in_features
        O, Opad, dim = self.out_features, self.o_pad, self.dim

        w_t, wpl_t = self._get_weights()

        # compute dtype: keep bf16 inputs in bf16 (weights are exact enough),
        # everything else runs in f32; accumulation is always f32.
        if inputs.dtype in (jnp.float32, jnp.bfloat16):
            dt = inputs.dtype
        else:
            dt = jnp.float32
        x = inputs.astype(dt)
        w_in = w_t.astype(dt)

        # ---- batch tiling ---------------------------------------------------
        tb = min(self.block_rows, B)
        if tb < B:
            tb = max(8, (tb // 8) * 8)          # sublane-aligned tile when tiling
            b_pad = _round_up(B, tb)
        else:
            b_pad = B                            # single full-batch block (always legal)
        if b_pad != B:
            x = jnp.pad(x, ((0, b_pad - B), (0, 0)))
        grid = (b_pad // tb,)

        y_pad = pl.pallas_call(
            _matmul_bias_kernel,
            out_shape=jax.ShapeDtypeStruct((b_pad, Opad), dt),
            grid_spec=pltpu.PrefetchScalarGridSpec(
                num_scalar_prefetch=0,
                grid=grid,
                in_specs=[
                    pl.BlockSpec((tb, I), lambda i: (i, 0)),
                    # constant index_map -> weight/bias DMA'd once, reused
                    # across all batch tiles
                    pl.BlockSpec((I, Opad), lambda i: (0, 0)),
                    pl.BlockSpec((1, Opad), lambda i: (0, 0)),
                ],
                out_specs=pl.BlockSpec((tb, Opad), lambda i: (i, 0)),
            ),
            compiler_params=pltpu.CompilerParams(
                dimension_semantics=("parallel",)),   # megacore shards batch tiles
        )(x, w_in, self.bias_pad)

        y = y_pad[:B, :O]

        # ---- log diagonal Jacobian blocks g ---------------------------------
        i_d, o_d = I // dim, O // dim
        wpl_valid = wpl_t[:, :O]                            # (I, O), already transposed
        blocks = wpl_valid.reshape(dim, i_d, dim, o_d)
        idx = jnp.arange(dim)
        wpl_blocks = blocks[idx, :, idx, :]                 # (dim, i_d, o_d)
        g = jnp.broadcast_to(jnp.swapaxes(wpl_blocks, -2, -1)[None],
                             (B, dim, o_d, i_d))

        if grad is None:
            return y, g
        # TODO(synk): log-Jacobian combination with `grad` kept in plain JAX
        # (tiny (B, dim, o_d, p, i_d) logsumexp; no benefit from a kernel).
        comb = g[..., None, :] + jnp.swapaxes(grad, -2, -1)[..., None, :, :]
        return y, jax.nn.logsumexp(comb, axis=-1)


if __name__ == "__main__":
    B, DIM = 64, 4
    in_features, out_features = 32, 32

    key = jax.random.PRNGKey(0)
    x = jax.random.normal(key, (B, in_features), dtype=jnp.float32)

    # block_rows=16 -> grid of 4 batch tiles (exercises pipelining/megacore path)
    module = MaskedWeight(in_features, out_features, DIM, bias=True,
                          seed=0, block_rows=16)
    y, g = module(x)
    y = jax.block_until_ready(y)
    g = jax.block_until_ready(g)

    # ---- pure numpy reference (mirrors the PyTorch forward) ----------------
    x_np = np.asarray(x, dtype=np.float32)
    W, dW = module._weight_np, module._diag_weight_np
    md, mo, b = module._mask_d_np, module._mask_o_np, module._bias_np
    w_full = np.exp(W) * md + W * mo
    wsn = (w_full ** 2).sum(-1, keepdims=True)
    w_n = np.exp(dW) * w_full / np.sqrt(wsn)
    wpl = dW + W - 0.5 * np.log(wsn)
    y_ref = x_np @ w_n.T + b

    i_d, o_d = in_features // DIM, out_features // DIM
    blocks_ref = wpl.T.reshape(DIM, i_d, DIM, o_d)
    wpl_blocks_ref = blocks_ref[np.arange(DIM), :, np.arange(DIM), :]
    g_ref = np.broadcast_to(np.swapaxes(wpl_blocks_ref, -2, -1)[None],
                            (B, DIM, o_d, i_d))

    np.testing.assert_allclose(np.asarray(y), y_ref, rtol=1e-4, atol=1e-4)
    np.testing.assert_allclose(np.asarray(g), g_ref, rtol=1e-5, atol=1e-5)
    print("KERNEL_OK")
</pallas_src>

<mosaic_0001>
module attributes {stable_mosaic.version = 11 : i64} {
  func.func @_get_weights_kernel(%arg0: i32, %arg1: memref<32x128xf32, #tpu.memory_space<vmem>>, %arg2: memref<1x128xf32, #tpu.memory_space<vmem>>, %arg3: memref<32x128xf32, #tpu.memory_space<vmem>>, %arg4: memref<32x128xf32, #tpu.memory_space<vmem>>, %arg5: memref<32x128xf32, #tpu.memory_space<vmem>>, %arg6: memref<32x128xf32, #tpu.memory_space<vmem>>) attributes {dimension_semantics = [#tpu.dimension_semantics<arbitrary>], iteration_bounds = array<i64: 1>, scalar_prefetch = 0 : i64, scratch_operands = 0 : i64, tpu.core_type = #tpu.core_type<tc>, window_params = [{pipeline_mode = #tpu.pipeline_mode<synchronous>, transform_indices = @transform_0, window_bounds = array<i64: 32, 128>}, {pipeline_mode = #tpu.pipeline_mode<synchronous>, transform_indices = @transform_1, window_bounds = array<i64: 1, 128>}, {pipeline_mode = #tpu.pipeline_mode<synchronous>, transform_indices = @transform_2, window_bounds = array<i64: 32, 128>}, {pipeline_mode = #tpu.pipeline_mode<synchronous>, transform_indices = @transform_3, window_bounds = array<i64: 32, 128>}, {pipeline_mode = #tpu.pipeline_mode<synchronous>, transform_indices = @transform_4, window_bounds = array<i64: 32, 128>}, {pipeline_mode = #tpu.pipeline_mode<synchronous>, transform_indices = @transform_5, window_bounds = array<i64: 32, 128>}]} {
    %c0 = arith.constant 0 : index
    %c0_0 = arith.constant 0 : index
    %0 = vector.load %arg1[%c0, %c0_0] : memref<32x128xf32, #tpu.memory_space<vmem>>, vector<32x128xf32>
    %c0_1 = arith.constant 0 : index
    %c0_2 = arith.constant 0 : index
    %1 = vector.load %arg3[%c0_1, %c0_2] : memref<32x128xf32, #tpu.memory_space<vmem>>, vector<32x128xf32>
    %c0_3 = arith.constant 0 : index
    %c0_4 = arith.constant 0 : index
    %2 = vector.load %arg4[%c0_3, %c0_4] : memref<32x128xf32, #tpu.memory_space<vmem>>, vector<32x128xf32>
    %c0_5 = arith.constant 0 : index
    %c0_6 = arith.constant 0 : index
    %3 = vector.load %arg2[%c0_5, %c0_6] : memref<1x128xf32, #tpu.memory_space<vmem>>, vector<1x128xf32>
    %4 = math.exp %0 : vector<32x128xf32>
    %5 = arith.mulf %4, %1 : vector<32x128xf32>
    %6 = arith.mulf %0, %2 : vector<32x128xf32>
    %7 = arith.addf %5, %6 : vector<32x128xf32>
    %8 = arith.mulf %7, %7 : vector<32x128xf32>
    %cst = arith.constant dense<0.000000e+00> : vector<128xf32>
    %9 = vector.multi_reduction <add>, %8, %cst [0] : vector<32x128xf32> to vector<128xf32>
    %10 = vector.shape_cast %9 : vector<128xf32> to vector<1x128xf32>
    %cst_7 = arith.constant 9.99999991E-38 : f32
    %11 = vector.broadcast %cst_7 : f32 to vector<1x128xf32>
    %12 = arith.maximumf %10, %11 : vector<1x128xf32>
    %13 = math.exp %3 : vector<1x128xf32>
    %14 = vector.broadcast %13 : vector<1x128xf32> to vector<32x128xf32>
    %15 = arith.mulf %14, %7 : vector<32x128xf32>
    %16 = math.rsqrt %12 : vector<1x128xf32>
    %17 = vector.broadcast %16 : vector<1x128xf32> to vector<32x128xf32>
    %18 = arith.mulf %15, %17 : vector<32x128xf32>
    %c0_8 = arith.constant 0 : index
    %c0_9 = arith.constant 0 : index
    %19 = vector.load %arg5[%c0_8, %c0_9] : memref<32x128xf32, #tpu.memory_space<vmem>>, vector<32x128xf32>
    tpu.vector_store %arg5[%c0_8, %c0_9], %18 {strides = array<i32>} : memref<32x128xf32, #tpu.memory_space<vmem>>, vector<32x128xf32>,
    %20 = vector.broadcast %3 : vector<1x128xf32> to vector<32x128xf32>
    %21 = arith.addf %20, %0 : vector<32x128xf32>
    %22 = math.log %12 : vector<1x128xf32>
    %cst_10 = arith.constant 5.000000e-01 : f32
    %23 = vector.broadcast %cst_10 : f32 to vector<1x128xf32>
    %24 = arith.mulf %23, %22 : vector<1x128xf32>
    %25 = vector.broadcast %24 : vector<1x128xf32> to vector<32x128xf32>
    %26 = arith.subf %21, %25 : vector<32x128xf32>
    %c0_11 = arith.constant 0 : index
    %c0_12 = arith.constant 0 : index
    %27 = vector.load %arg6[%c0_11, %c0_12] : memref<32x128xf32, #tpu.memory_space<vmem>>, vector<32x128xf32>
    tpu.vector_store %arg6[%c0_11, %c0_12], %26 {strides = array<i32>} : memref<32x128xf32, #tpu.memory_space<vmem>>, vector<32x128xf32>,
    return
  }
  func.func @transform_0(%arg0: i32) -> (i32, i32) {
    %c0_i32 = arith.constant 0 : i32
    %c0_i32_0 = arith.constant 0 : i32
    %c0_i32_1 = arith.constant 0 : i32
    return %c0_i32, %c0_i32_0 : i32, i32
  }
  func.func @transform_1(%arg0: i32) -> (i32, i32) {
    %c0_i32 = arith.constant 0 : i32
    %c0_i32_0 = arith.constant 0 : i32
    %c0_i32_1 = arith.constant 0 : i32
    return %c0_i32, %c0_i32_0 : i32, i32
  }
  func.func @transform_2(%arg0: i32) -> (i32, i32) {
    %c0_i32 = arith.constant 0 : i32
    %c0_i32_0 = arith.constant 0 : i32
    %c0_i32_1 = arith.constant 0 : i32
    return %c0_i32, %c0_i32_0 : i32, i32
  }
  func.func @transform_3(%arg0: i32) -> (i32, i32) {
    %c0_i32 = arith.constant 0 : i32
    %c0_i32_0 = arith.constant 0 : i32
    %c0_i32_1 = arith.constant 0 : i32
    return %c0_i32, %c0_i32_0 : i32, i32
  }
  func.func @transform_4(%arg0: i32) -> (i32, i32) {
    %c0_i32 = arith.constant 0 : i32
    %c0_i32_0 = arith.constant 0 : i32
    %c0_i32_1 = arith.constant 0 : i32
    return %c0_i32, %c0_i32_0 : i32, i32
  }
  func.func @transform_5(%arg0: i32) -> (i32, i32) {
    %c0_i32 = arith.constant 0 : i32
    %c0_i32_0 = arith.constant 0 : i32
    %c0_i32_1 = arith.constant 0 : i32
    return %c0_i32, %c0_i32_0 : i32, i32
  }
}

</mosaic_0001>

<bundles_post_ra>
// kernel: tpu_custom_call.1
= control target key start
LH: loop header
LB: loop body
LE: loop exit
PB: predicated region body
PF: predicated region fallthrough
CT: control target
= control target key end

     0   :  { %11 = vsyncpa [#allocation3], 0  ;;  %s404_s0 = inlined_call_operand.hbm [shape: f32[32,128], index: 0, kind: input, shape index: {}]   ;;  %s405_s1 = inlined_call_operand.vmem [shape: f32[1,128], index: 1, kind: input, shape index: {}]   ;;  %s406_s2 = inlined_call_operand.hbm [shape: f32[32,128], index: 2, kind: input, shape index: {}]   ;;  %s407_s3 = inlined_call_operand.hbm [shape: f32[32,128], index: 3, kind: input, shape index: {}]   ;;  %s408_s4 = inlined_call_operand.hbm [shape: f32[32,128], index: 4, kind: output, shape index: {0}]   ;;  %s409_s5 = inlined_call_operand.hbm [shape: f32[32,128], index: 5, kind: output, shape index: {1}]  }
   0x1   :  { %12 = vsyncpa [#allocation6], 0 }
   0x2   :  { %13 = vsyncpa [#allocation4], 0 }
   0x3   :  { %14 = vsyncpa [#allocation10], 0  ;;  %s314_s18 = smov [#allocation5]   ;;  %s315_s20 = smov [#allocation2]  }
   0x4   :  { %s34_s19 = sshll.u32 %s314_s18, 4  ;;  %s20_s21 = sshll.u32 %s315_s20, 4  ;;  %s35_s19 = int_to_ptr.vmem [resolvable:$true] %s34_s19  ;;  %s21_s21 = int_to_ptr.vmem [resolvable:$true] %s20_s21 }
   0x5   :  { %s214_s22 = scalar_lea.vmem %s35_s19, 512  ;;  %p219_p1 = scmp.lt.s32.totalorder %s35_s19, %s35_s19 }
   0x6   :  { %p215_p0 = scmp.ne.s32.totalorder %s35_s19, %s214_s22  ;;  %p220_p2 = scmp.lt.s32.totalorder %s214_s22, %s214_s22 }
   0x8   :  { %p221_p3 = por %p220_p2, %p219_p1 }
   0xa   :  { %p222_p4 = pnand %p221_p3, %p215_p0 }
   0xc   :  { %225 = shalt.err (!%p222_p4)
}
   0xd   :  { %s316_s23 = smov 128   ;;  %s317_s24 = smov 8  }
   0xe   :  { %40 = dma.hbm_to_vmem [thread:$0]  %s406_s2, 512, %s35_s19, [#allocation6], %s316_s23, %s316_s23, %s317_s24  }
   0xf   :  { %s234_s27 = scalar_lea.vmem %s21_s21, 512  ;;  %p239_p6 = scmp.lt.s32.totalorder %s21_s21, %s21_s21 }
  0x10   :  { %p235_p5 = scmp.ne.s32.totalorder %s21_s21, %s234_s27  ;;  %p240_p7 = scmp.lt.s32.totalorder %s234_s27, %s234_s27 }
  0x12   :  { %p241_p8 = por %p240_p7, %p239_p6 }
  0x14   :  { %p242_p9 = pnand %p241_p8, %p235_p5 }
  0x16   :  { %245 = shalt.err (!%p242_p9)
}
  0x17   :  { %26 = dma.hbm_to_vmem [thread:$0]  %s404_s0, 512, %s21_s21, [#allocation3], %s316_s23, %s316_s23, %s317_s24  }
  0x18   :  { %s318_s30 = smov [#allocation7]  }
  0x19   :  { %s46_s6 = sshll.u32 %s318_s30, 4  ;;  %s47_s6 = int_to_ptr.vmem [resolvable:$true] %s46_s6 }
  0x1a   :  { %s254_s7 = scalar_lea.vmem %s47_s6, 512  ;;  %p259_p11 = scmp.lt.s32.totalorder %s47_s6, %s47_s6 }
  0x1b   :  { %p255_p10 = scmp.ne.s32.totalorder %s47_s6, %s254_s7  ;;  %p260_p12 = scmp.lt.s32.totalorder %s254_s7, %s254_s7 }
  0x1d   :  { %p261_p13 = por %p260_p12, %p259_p11 }
  0x1f   :  { %p262_p0 = pnand %p261_p13, %p255_p10 }
  0x21   :  { %265 = shalt.err (!%p262_p0)
}
  0x22   :  { %52 = dma.hbm_to_vmem [thread:$0]  %s407_s3, 512, %s47_s6, [#allocation6], %s316_s23, %s316_s23, %s317_s24  }
  0x23   :  { %306 = dma.done.wait [#allocation3], 512  }
  0x24   :  { %307 = vsyncadd [#allocation3], 4294966784 }
  0x25   :  { %308 = dma.done.wait [#allocation6], 1024  }
  0x26   :  { %309 = vsyncadd [#allocation6], 4294966272  ;;  %v369_v0 = vld [vmem:[#allocation2] sm:$0xff]  ;;  %v371_v1 = vld [vmem:[#allocation2 + $0x8] sm:$0xff]  ;;  %v112_v46 = vlaneseq  ;;  %s320_s10 = smov [#allocation9]  }
  0x27   :  { %v373_v2 = vld [vmem:[#allocation2 + $0x10] sm:$0xff]  ;;  %v375_v3 = vld [vmem:[#allocation2 + $0x18] sm:$0xff]  ;;  %v75_v4 = vmul.f32 1.442695, %v369_v0  ;;  %v77_v5 = vmul.f32 1.442695, %v371_v1 }
  0x28   :  { %v79_v6 = vmul.f32 1.442695, %v373_v2  ;;  %v81_v7 = vmul.f32 1.442695, %v375_v3  ;;  %v70_v8 = vld [vmem:[#allocation7] sm:$0xff]  ;;  %v71_v9 = vld [vmem:[#allocation7 + $0x8] sm:$0xff] }
  0x29   :  { %192 = vpow2.f32 %v75_v4  ;;  %v66_v10 = vld [vmem:[#allocation5] sm:$0xff]  ;;  %v72_v11 = vld [vmem:[#allocation7 + $0x10] sm:$0xff]  ;;  %v67_v12 = vld [vmem:[#allocation5 + $0x8] sm:$0xff]  ;;  %v87_v14 = vmul.f32 %v70_v8, %v369_v0  ;;  %v88_v17 = vmul.f32 %v71_v9, %v371_v1  ;;  %v113_v49 = vshrl.u32 %v112_v46, 7  ;;  %s168_s11 = sshll.u32 %s320_s10, 4  ;;  %s169_s11 = int_to_ptr.vmem [resolvable:$true] %s168_s11 }
  0x2a   :  { %194 = vpow2.f32 %v77_v5  ;;  %v73_v13 = vld [vmem:[#allocation7 + $0x18] sm:$0xff]  ;;  %v68_v16 = vld [vmem:[#allocation5 + $0x10] sm:$0xff]  ;;  %v89_v21 = vmul.f32 %v72_v11, %v373_v2  ;;  %v74_v38 = vld [vmem:[%s405_s1] sm:$0x1]  ;;  %s319_s1 = smov [#allocation8]  }
  0x2b   :  { %196 = vpow2.f32 %v79_v6  ;;  %v69_v19 = vld [vmem:[#allocation5 + $0x18] sm:$0xff]  ;;  %v90_v24 = vmul.f32 %v73_v13, %v375_v3  ;;  %v109_v41 = vmul.f32 1.442695, %v74_v38  ;;  %v114_v50 = vsub.s32 0, %v113_v49  ;;  %s156_s9 = sshll.u32 %s319_s1, 4  ;;  %s157_s9 = int_to_ptr.vmem [resolvable:$true] %s156_s9 }
  0x2c   :  { %198 = vpow2.f32 %v81_v7  ;;  %s266_s12 = scalar_lea.vmem %s157_s9, 512  ;;  %p271_p2 = scmp.lt.s32.totalorder %s157_s9, %s157_s9 }
  0x2d   :  { %200 = vpow2.f32 %v109_v41  ;;  %v134_v53 = vrot.slane %v74_v38, %v114_v50  ;;  %p267_p1 = scmp.ne.s32.totalorder %s157_s9, %s266_s12  ;;  %p272_p3 = scmp.lt.s32.totalorder %s266_s12, %s266_s12 }
  0x2f   :  { %v136_v59 = vadd.f32 %v134_v53, %v369_v0  ;;  %v137_v6 = vadd.f32 %v134_v53, %v371_v1  ;;  %v138_v7 = vadd.f32 %v134_v53, %v373_v2  ;;  %v139_v8 = vadd.f32 %v134_v53, %v375_v3  ;;  %p273_p4 = por %p272_p3, %p271_p2 }
  0x31   :  { %p274_p5 = pnand %p273_p4, %p267_p1 }
  0x36   :  { %v193_v15 = vpop.eup %192 }
  0x37   :  { %v195_v18 = vpop.eup %194  ;;  %v83_v20 = vmul.f32 %v193_v15, %v66_v10 }
  0x38   :  { %v197_v22 = vpop.eup %196  ;;  %v84_v23 = vmul.f32 %v195_v18, %v67_v12 }
  0x39   :  { %v199_v25 = vpop.eup %198  ;;  %v85_v26 = vmul.f32 %v197_v22, %v68_v16  ;;  %v91_v27 = vadd.f32 %v87_v14, %v83_v20 }
  0x3a   :  { %v86_v28 = vmul.f32 %v199_v25, %v69_v19  ;;  %v92_v29 = vadd.f32 %v88_v17, %v84_v23  ;;  %v201_v51 = vpop.eup %200 }
  0x3b   :  { %v93_v30 = vadd.f32 %v89_v21, %v85_v26  ;;  %v95_v31 = vmul.f32 %v91_v27, %v91_v27  ;;  %v115_v52 = vrot.slane %v201_v51, %v114_v50 }
  0x3c   :  { %v94_v32 = vadd.f32 %v90_v24, %v86_v28  ;;  %v96_v33 = vmul.f32 %v92_v29, %v92_v29 }
  0x3d   :  { %v97_v34 = vmul.f32 %v93_v30, %v93_v30  ;;  %v117_v54 = vmul.f32 %v115_v52, %v91_v27  ;;  %v118_v55 = vmul.f32 %v115_v52, %v92_v29  ;;  %v119_v56 = vmul.f32 %v115_v52, %v93_v30 }
  0x3e   :  { %v98_v35 = vmul.f32 %v94_v32, %v94_v32  ;;  %v99_v36 = vadd.f32 %v96_v33, %v95_v31  ;;  %v120_v57 = vmul.f32 %v115_v52, %v94_v32 }
  0x40   :  { %v100_v37 = vadd.f32 %v99_v36, %v97_v34 }
  0x42   :  { %v101_v39 = vadd.f32 %v100_v37, %v98_v35 }
  0x44   :  { %v102_v40 = vrot.slane %v101_v39, 4 }
  0x46   :  { %v103_v42 = vadd.f32 %v102_v40, %v101_v39 }
  0x48   :  { %v104_v43 = vrot.slane %v103_v42, 2 }
  0x4a   :  { %v105_v44 = vadd.f32 %v104_v43, %v103_v42 }
  0x4c   :  { %v106_v45 = vrot.slane %v105_v44, 1 }
  0x4e   :  { %v107_v47 = vadd.f32 %v106_v45, %v105_v44 }
  0x50   :  { %v108_v48 = vmax.f32 %v107_v47, 1e-37 }
  0x52   :  { %202 = vrsqrt.f32 %v108_v48 }
  0x53   :  { %204 = vlog2.f32 %v108_v48 }
  0x5f   :  { %v203_v58 = vpop.eup %202 }
  0x60   :  { %v205_v60 = vpop.eup %204  ;;  %v122_v61 = vmul.f32 %v203_v58, %v117_v54  ;;  %v123_v62 = vmul.f32 %v203_v58, %v118_v55  ;;  %v124_v63 = vmul.f32 %v203_v58, %v119_v56  ;;  %v125_v4 = vmul.f32 %v203_v58, %v120_v57 }
  0x61   :  { %v141_v5 = vmul.f32 0.6931472, %v205_v60 }
  0x62   :  { %126 = vst [vmem:[#allocation8] sm:$0xff] %v122_v61  ;;  %127 = vst [vmem:[#allocation8 + $0x8] sm:$0xff] %v123_v62 }
  0x63   :  { %128 = vst [vmem:[#allocation8 + $0x10] sm:$0xff] %v124_v63  ;;  %129 = vst [vmem:[#allocation8 + $0x18] sm:$0xff] %v125_v4  ;;  %v142_v0 = vmul.f32 0.5, %v141_v5 }
  0x64   :  { %277 = shalt.err (!%p274_p5)
}
  0x65   :  { %162 = dma.vmem_to_hbm [thread:$0]  %s157_s9, 512, %s408_s4, [#allocation4], %s316_s23, %s316_s23, %s317_s24   ;;  %v143_v1 = vsub.f32 %v136_v59, %v142_v0  ;;  %v144_v2 = vsub.f32 %v137_v6, %v142_v0  ;;  %v145_v3 = vsub.f32 %v138_v7, %v142_v0  ;;  %v146_v9 = vsub.f32 %v139_v8, %v142_v0 }
  0x66   :  { %s286_s15 = scalar_lea.vmem %s169_s11, 512  ;;  %p291_p7 = scmp.lt.s32.totalorder %s169_s11, %s169_s11 }
  0x67   :  { %147 = vst [vmem:[#allocation9] sm:$0xff] %v143_v1  ;;  %148 = vst [vmem:[#allocation9 + $0x8] sm:$0xff] %v144_v2  ;;  %p287_p6 = scmp.ne.s32.totalorder %s169_s11, %s286_s15  ;;  %p292_p8 = scmp.lt.s32.totalorder %s286_s15, %s286_s15 }
  0x68   :  { %149 = vst [vmem:[#allocation9 + $0x10] sm:$0xff] %v145_v3  ;;  %150 = vst [vmem:[#allocation9 + $0x18] sm:$0xff] %v146_v9 }
  0x69   :  { %p293_p9 = por %p292_p8, %p291_p7 }
  0x6b   :  { %p294_p10 = pnand %p293_p9, %p287_p6 }
  0x6d   :  { %297 = shalt.err (!%p294_p10)
}
  0x6e   :  { %174 = dma.vmem_to_hbm [thread:$0]  %s169_s11, 512, %s409_s5, [#allocation10], %s316_s23, %s316_s23, %s317_s24  }
  0x6f   :  { %310 = dma.done.wait [#allocation4], 512  }
  0x70   :  { %311 = vsyncadd [#allocation4], 4294966784 }
  0x71   :  { %312 = dma.done.wait [#allocation10], 512  }
  0x72   :  { %313 = vsyncadd [#allocation10], 4294966784 }
  0x73   :  { %181 = vsyncpa [#allocation3], 1 }
  0x74   :  { %182 = vsyncpa [#allocation6], 1 }
  0x75   :  { %183 = vsyncpa [#allocation4], 1 }
  0x76   :  { %184 = vsyncpa [#allocation10], 1 }

</bundles_post_ra>
